<compile_context>
chip_gen: v7x
topology: tpu7x:2x2x1
jax: 0.10.0
libtpu: 0.0.40
codegen_flags: <defaults>
</compile_context>

<pallas_src>
import math

import jax
import jax.numpy as jnp
from jax.experimental import pallas as pl
from jax.experimental.pallas import tpu as pltpu


def _fused_kernel(g_ref, w_ref, b_ref, o_ref):
    """One block of Bb batches: o = g @ W_fused + b_fused.

    g_ref: (Bb, C)   graph rows
    w_ref: (C, C)    fused (value -> proj) weight, (in, out) layout
    b_ref: (1, C)    fused bias
    o_ref: (Bb, C)   per-batch output row (broadcast over T happens outside)
    """
    o_ref[...] = (
        jnp.dot(g_ref[...], w_ref[...], preferred_element_type=jnp.float32)
        + b_ref[...]
    ).astype(o_ref.dtype)


def _pick_block_rows(B: int, C: int, itemsize: int = 4) -> int:
    """Batch-block size.

    Largest multiple of 8 dividing B, bounded by a conservative per-tile VMEM
    budget (valid on v7x's 64 MiB VMEM) and, when B allows it, small enough to
    give >= 2 grid steps so v7x's two TensorCores both get work.
    """
    if B % 8 != 0:
        # Full-array block: allowed by the "block dim equals full array dim" rule.
        return B
    budget = 8 << 20                                      # bytes per-tile budget
    rows_cap = max(8, budget // (2 * 2 * C * itemsize))   # dbl-buffered in + out
    prefer = B // 2 if (B // 2) % 8 == 0 else B           # aim for >= 2 grid steps
    limit = min(rows_cap, prefer)
    best = 8
    d = 8
    while d <= limit:
        if B % d == 0:
            best = d
        d += 8
    return best


def causal_cross_attention(x, graph, params, n_head):
    """x: (B, T, C) f32, graph: (B, 1, C) f32. Returns (B, T, C) f32.

    Matches CausalCrossAttention_masked_for_formula.forward in eval mode.
    The output depends on x only through its shape (the length-1 key axis
    makes the softmax identically 1, so q/k are dead).
    """
    B, T, C = x.shape
    assert C % n_head == 0

    # Fuse value -> proj into one affine map, computed once in XLA.
    # rows = (g @ Wv^T + bv) @ Wp^T + bp = g @ (Wv^T Wp^T) + (bv Wp^T + bp)
    w_fused = params["wv"].T @ params["wp"].T            # (C, C), (in, out)
    b_fused = (params["bv"] @ params["wp"].T + params["bp"]).reshape(1, C)

    g2d = graph.reshape(B, C)                            # (B,1,C) contiguous -> free

    Bb = _pick_block_rows(B, C)
    grid = (B // Bb,)

    # Explicit VMEM limit: actual need (dbl-buffered g + out, weights, bias)
    # with generous headroom, capped at the 32 MiB scoped default so the same
    # setting is safe on v5e / v6e / v7x.
    need = 4 * (2 * 2 * Bb * C + C * C + 2 * C)
    vmem_limit = int(min(max(4 * need, 1 << 20), 32 << 20))

    rows = pl.pallas_call(
        _fused_kernel,
        out_shape=jax.ShapeDtypeStruct((B, C), jnp.float32),
        grid_spec=pltpu.PrefetchScalarGridSpec(
            num_scalar_prefetch=0,
            grid=grid,
            in_specs=[
                pl.BlockSpec((Bb, C), lambda i: (i, 0)),   # graph rows
                pl.BlockSpec((C, C), lambda i: (0, 0)),    # fused weight (VMEM-resident)
                pl.BlockSpec((1, C), lambda i: (0, 0)),    # fused bias
            ],
            out_specs=pl.BlockSpec((Bb, C), lambda i: (i, 0)),
        ),
        compiler_params=pltpu.CompilerParams(
            dimension_semantics=("parallel",),
            vmem_limit_bytes=vmem_limit,
        ),
    )(g2d, w_fused, b_fused)

    # O(B*T*C) broadcast done by XLA (fuses with downstream consumers; kernel
    # cost stays independent of T).
    return jnp.broadcast_to(rows[:, None, :], (B, T, C))


def _reference(x, graph, params, n_head):
    """Pure-JAX reference mirroring the PyTorch forward (eval mode), full attention math."""
    B, T, C = x.shape
    hs = C // n_head

    def lin(inp, w, b):
        return inp @ w.T + b

    k = lin(graph, params["wk"], params["bk"]).reshape(B, 1, n_head, hs).transpose(0, 2, 1, 3)
    q = lin(x, params["wq"], params["bq"]).reshape(B, T, n_head, hs).transpose(0, 2, 1, 3)
    v = lin(graph, params["wv"], params["bv"]).reshape(B, 1, n_head, hs).transpose(0, 2, 1, 3)
    att = jnp.einsum("bhtd,bhkd->bhtk", q, k) * (1.0 / math.sqrt(hs))
    att = jax.nn.softmax(att, axis=-1)
    y = jnp.einsum("bhtk,bhkd->bhtd", att, v)
    y = y.transpose(0, 2, 1, 3).reshape(B, T, C)
    return lin(y, params["wp"], params["bp"])


if __name__ == "__main__":
    B, T, C = 2, 8, 32
    n_head = 4

    key = jax.random.PRNGKey(0)
    keys = jax.random.split(key, 12)

    x = jax.random.normal(keys[0], (B, T, C), jnp.float32)
    graph = jax.random.normal(keys[1], (B, 1, C), jnp.float32)

    s = 0.05
    params = {
        "wq": jax.random.normal(keys[2], (C, C), jnp.float32) * s,
        "bq": jax.random.normal(keys[3], (C,), jnp.float32) * s,
        "wk": jax.random.normal(keys[4], (C, C), jnp.float32) * s,
        "bk": jax.random.normal(keys[5], (C,), jnp.float32) * s,
        "wv": jax.random.normal(keys[6], (C, C), jnp.float32) * s,
        "bv": jax.random.normal(keys[7], (C,), jnp.float32) * s,
        "wp": jax.random.normal(keys[8], (C, C), jnp.float32) * s,
        "bp": jax.random.normal(keys[9], (C,), jnp.float32) * s,
    }

    attn = jax.jit(causal_cross_attention, static_argnames=("n_head",))
    out = attn(x, graph, params, n_head=n_head)
    out = jax.block_until_ready(out)

    ref = _reference(x, graph, params, n_head)
    assert out.shape == (B, T, C)
    assert jnp.max(jnp.abs(out - ref)) < 1e-4, "mismatch vs reference"

    print("KERNEL_OK")
</pallas_src>

<mosaic_0001>
module attributes {stable_mosaic.version = 11 : i64} {
  func.func @_fused_kernel(%arg0: i32, %arg1: memref<2x32xf32, #tpu.memory_space<vmem>>, %arg2: memref<32x32xf32, #tpu.memory_space<vmem>>, %arg3: memref<1x32xf32, #tpu.memory_space<vmem>>, %arg4: memref<2x32xf32, #tpu.memory_space<vmem>>) attributes {dimension_semantics = [#tpu.dimension_semantics<parallel>], iteration_bounds = array<i64: 1>, scalar_prefetch = 0 : i64, scratch_operands = 0 : i64, tpu.core_type = #tpu.core_type<tc>, window_params = [{transform_indices = @transform_0, window_bounds = array<i64: 2, 32>}, {pipeline_mode = #tpu.pipeline_mode<synchronous>, transform_indices = @transform_1, window_bounds = array<i64: 32, 32>}, {pipeline_mode = #tpu.pipeline_mode<synchronous>, transform_indices = @transform_2, window_bounds = array<i64: 1, 32>}, {transform_indices = @transform_3, window_bounds = array<i64: 2, 32>}]} {
    %c0 = arith.constant 0 : index
    %c0_0 = arith.constant 0 : index
    %0 = vector.load %arg1[%c0, %c0_0] : memref<2x32xf32, #tpu.memory_space<vmem>>, vector<2x32xf32>
    %c0_1 = arith.constant 0 : index
    %c0_2 = arith.constant 0 : index
    %1 = vector.load %arg2[%c0_1, %c0_2] : memref<32x32xf32, #tpu.memory_space<vmem>>, vector<32x32xf32>
    %cst = arith.constant dense<0.000000e+00> : vector<2x32xf32>
    %2 = tpu.matmul %0, %1, %cst {dimension_numbers = #tpu.dot_dimension_numbers<[1], [0], [0], [1], [0, 0, 1, 1], [], []>} : vector<2x32xf32>, vector<32x32xf32>, vector<2x32xf32> -> vector<2x32xf32>
    %c0_3 = arith.constant 0 : index
    %c0_4 = arith.constant 0 : index
    %3 = vector.load %arg3[%c0_3, %c0_4] : memref<1x32xf32, #tpu.memory_space<vmem>>, vector<1x32xf32>
    %4 = vector.broadcast %3 : vector<1x32xf32> to vector<2x32xf32>
    %5 = arith.addf %2, %4 : vector<2x32xf32>
    %c0_5 = arith.constant 0 : index
    %c0_6 = arith.constant 0 : index
    %6 = vector.load %arg4[%c0_5, %c0_6] : memref<2x32xf32, #tpu.memory_space<vmem>>, vector<2x32xf32>
    tpu.vector_store %arg4[%c0_5, %c0_6], %5 {strides = array<i32>} : memref<2x32xf32, #tpu.memory_space<vmem>>, vector<2x32xf32>,
    return
  }
  func.func @transform_0(%arg0: i32) -> (i32, i32) {
    %c0_i32 = arith.constant 0 : i32
    %c0_i32_0 = arith.constant 0 : i32
    return %arg0, %c0_i32 : i32, i32
  }
  func.func @transform_1(%arg0: i32) -> (i32, i32) {
    %c0_i32 = arith.constant 0 : i32
    %c0_i32_0 = arith.constant 0 : i32
    %c0_i32_1 = arith.constant 0 : i32
    return %c0_i32, %c0_i32_0 : i32, i32
  }
  func.func @transform_2(%arg0: i32) -> (i32, i32) {
    %c0_i32 = arith.constant 0 : i32
    %c0_i32_0 = arith.constant 0 : i32
    %c0_i32_1 = arith.constant 0 : i32
    return %c0_i32, %c0_i32_0 : i32, i32
  }
  func.func @transform_3(%arg0: i32) -> (i32, i32) {
    %c0_i32 = arith.constant 0 : i32
    %c0_i32_0 = arith.constant 0 : i32
    return %arg0, %c0_i32 : i32, i32
  }
}

</mosaic_0001>

<bundles_post_ra>
// kernel: causal_cross_attention.1
= control target key start
LH: loop header
LB: loop body
LE: loop exit
PB: predicated region body
PF: predicated region fallthrough
CT: control target
= control target key end

     0   :  { %v133_v0 = vmov 0.0|0.0   ;;  %vm134_vm0 = vmmov 0   ;;  %v135_v4 = vmov 0.0   ;;  %vm26_vm1 = vcmask 261120   ;;  %s177_s1 = inlined_call_operand.vmem [shape: f32[32,32], index: 1, kind: input, shape index: {}]   ;;  %s178_s0 = inlined_call_operand.vmem [shape: f32[2,32], index: 0, kind: input, shape index: {}]   ;;  %s179_s2 = inlined_call_operand.vmem [shape: f32[1,32], index: 2, kind: input, shape index: {}]   ;;  %s180_s3 = inlined_call_operand.vmem [shape: f32[2,32], index: 3, kind: output, shape index: {}]  }
   0x1   :  { %124 = vmatprep.subr.bf16.mxu0 %v133_v0  ;;  %v15_v1 = vld [vmem:[%s177_s1] sm:$0xff]  ;;  %v16_v2 = vld [vmem:[%s177_s1 + $0x8] sm:$0xff]  ;;  %v17_v3 = vld [vmem:[%s177_s1 + $0x10] sm:$0xff]  ;;  %121 = vmatprep.mubr.msk.f32.mxu0 %vm134_vm0, %v135_v4  ;;  %vm100_vm2 = vcmask 254976  }
   0x2   :  { %v125_v5 = vpack.c.bf16 %v16_v2, %v15_v1  ;;  %v18_v6 = vld [vmem:[%s177_s1 + $0x18] sm:$0xff]  ;;  %v14_v8 = vld [vmem:[%s178_s0] sm:$0x3] }
   0x3   :  { %v128_v7 = vpack.c.bf16 %v18_v6, %v17_v3  ;;  %v106_v9 = vld [vmem:[%s179_s2] ss:$0 sm:$0xff] }
   0x4   :  { %126 = vmatpush3.bf16.msra.mxu0 %v125_v5 }
   0x5   :  { %127 = vmatprep.subr.bf16.mxu0 %v133_v0 }
   0x8   :  { %129 = vmatpush3.bf16.msra.mxu0 %v128_v7 }
   0xb   :  { %122 = vmatmul.mubr.msk.f32.vlgmr.msra.gmra.mrb[0].mxu0 %vm26_vm1, %v14_v8 }
  0xde   :  { %v96_v10 = vpop.f32.mrb[0].mxu0 }
  0xdf   :  { %v97_v11 = vadd.f32 %v106_v9, %v96_v10  ;;  %v123_v12 = vpop.f32.mrb[1].mxu0 }
  0xe1   :  { %101 = vst.msk [vmem:[%s180_s3] sm:$0x3] %vm100_vm2, %v97_v11 }

</bundles_post_ra>
